<compile_context>
chip_gen: v6e
topology: v6e:2x2x1
jax: 0.10.0
libtpu: 0.0.40
codegen_flags: <defaults>
</compile_context>

<pallas_src>
import jax
import jax.numpy as jnp
from jax.experimental import pallas as pl
from jax.experimental.pallas import tpu as pltpu


def _round_up(x: int, m: int) -> int:
    return (x + m - 1) // m * m


def _fc_kernel(x_ref, w1_ref, b1_ref, w2_ref, b2_ref, o_ref):
    # hidden = relu(x @ W1 + b1): bf16 MXU operands, f32 accumulation,
    # bias-add / ReLU in f32 on the VPU.
    h = jnp.dot(x_ref[...].astype(jnp.bfloat16), w1_ref[...],
                preferred_element_type=jnp.float32)
    h = jnp.maximum(h + b1_ref[...], 0.0)          # (TM, H) + (1, H) broadcast
    # out = hidden @ W2 + b2 (h re-cast to bf16 for the MXU, f32 accumulation)
    o = jnp.dot(h.astype(jnp.bfloat16), w2_ref[...],
                preferred_element_type=jnp.float32)
    o_ref[...] = (o + b2_ref[...]).astype(o_ref.dtype)


def prepare_params(w1, b1, w2, b2):
    """One-time parameter layout (do NOT call per forward): bf16 weights for
    the MXU, f32 row-vector biases for the VPU."""
    return (jnp.asarray(w1, jnp.bfloat16),
            jnp.asarray(b1, jnp.float32).reshape(1, -1),
            jnp.asarray(w2, jnp.bfloat16),
            jnp.asarray(b2, jnp.float32).reshape(1, -1))


def fully_connected_forward(x, w1_bf, b1_row, w2_bf, b2_row, *, tm: int = 256):
    """x: (B, S, Din) f32; w1_bf: (Din, H) bf16; b1_row: (1, H) f32;
    w2_bf: (H, Dout) bf16; b2_row: (1, Dout) f32.  Returns (B, S, Dout) f32."""
    B, S, Din = x.shape
    H = w1_bf.shape[1]
    Dout = w2_bf.shape[1]
    M = B * S

    # --- M tiling: TM always a multiple of 8; capped at ~ceil(M/4) so the grid
    # has >= ~4 steps (lets v7x use both TensorCores); never larger than
    # round_up(M, 8).  grid = cdiv(M, TM) -> no row padding, partial last tile
    # is masked on store (rows are independent, so garbage rows can't leak).
    tm8 = max(8, _round_up(tm, 8))
    cap = max(8, _round_up(pl.cdiv(M, 4), 8))
    TM = min(tm8, cap, _round_up(M, 8))
    grid = (pl.cdiv(M, TM),)

    # --- VMEM guard: resident weights are single-buffered (Buffered(1)), so
    # their footprint is 2*(Din*H + H*Dout) + 4*(H + Dout) bytes (~6 KiB here).
    # For layer widths where this approaches the v7x budget (tens of MiB),
    # switch to a K/N-tiled grid with a pl.when-initialized accumulator.
    resident_bytes = 2 * (Din * H + H * Dout) + 4 * (H + Dout)
    assert resident_bytes < 16 * 1024 * 1024, (
        "resident-weight strategy would blow VMEM; tile K/N instead")

    x2d = x.reshape(M, Din)   # metadata-only reshape; no HBM copy

    cost = pl.CostEstimate(
        flops=2 * M * (Din * H + H * Dout),
        transcendentals=0,
        bytes_accessed=(4 * M * Din + 4 * M * Dout
                        + 2 * (Din * H + H * Dout) + 4 * (H + Dout)),
    )

    out2d = pl.pallas_call(
        _fc_kernel,
        out_shape=jax.ShapeDtypeStruct((M, Dout), jnp.float32),
        grid_spec=pltpu.PrefetchScalarGridSpec(
            num_scalar_prefetch=0,
            grid=grid,
            in_specs=[
                # x: streamed over rows (default double-buffered pipelining).
                pl.BlockSpec((TM, Din), lambda i: (i, 0)),
                # weights & biases: constant block index -> DMA'd once and kept
                # VMEM-resident; Buffered(1) drops the useless second buffer.
                pl.BlockSpec((Din, H), lambda i: (0, 0),
                             pipeline_mode=pl.Buffered(1)),
                pl.BlockSpec((1, H), lambda i: (0, 0),
                             pipeline_mode=pl.Buffered(1)),
                pl.BlockSpec((H, Dout), lambda i: (0, 0),
                             pipeline_mode=pl.Buffered(1)),
                pl.BlockSpec((1, Dout), lambda i: (0, 0),
                             pipeline_mode=pl.Buffered(1)),
            ],
            out_specs=pl.BlockSpec((TM, Dout), lambda i: (i, 0)),
        ),
        compiler_params=pltpu.CompilerParams(
            # pure data-parallel axis: lets v7x shard across its 2 TensorCores
            dimension_semantics=("parallel",),
        ),
        cost_estimate=cost,
    )(x2d, w1_bf, b1_row, w2_bf, b2_row)

    return out2d.reshape(B, S, Dout)


if __name__ == "__main__":
    # Module hyperparameters (small, consistent with the forward pass)
    input_shape = 32   # in_features of linear1
    num_of_l2 = 64     # hidden width
    output_shape = 16  # out_features of linear2
    B, S = 2, 8        # Softmax(dim=2) in __init__ implies a 3-D [B, S, F] input

    key = jax.random.PRNGKey(0)
    kx, kw1, kb1, kw2, kb2 = jax.random.split(key, 5)

    # Deterministic init mimicking nn.Linear's U(-1/sqrt(fan_in), 1/sqrt(fan_in)).
    # Weights stored as (in, out), i.e. transpose of PyTorch's (out, in) layout.
    bound1 = 1.0 / jnp.sqrt(jnp.float32(input_shape))
    bound2 = 1.0 / jnp.sqrt(jnp.float32(num_of_l2))
    w1 = jax.random.uniform(kw1, (input_shape, num_of_l2), jnp.float32, -bound1, bound1)
    b1 = jax.random.uniform(kb1, (num_of_l2,), jnp.float32, -bound1, bound1)
    w2 = jax.random.uniform(kw2, (num_of_l2, output_shape), jnp.float32, -bound2, bound2)
    b2 = jax.random.uniform(kb2, (output_shape,), jnp.float32, -bound2, bound2)

    x = jax.random.normal(kx, (B, S, input_shape), jnp.float32)

    # One-time parameter layout (bf16 weights, f32 row biases) outside the
    # per-forward path.
    params = prepare_params(w1, b1, w2, b2)

    out = fully_connected_forward(x, *params)
    out = jax.block_until_ready(out)
    assert out.shape == (B, S, output_shape)

    # Pure-f32 JAX reference.  Kernel feeds the MXU bf16 operands with f32
    # accumulation, so allow bf16-level tolerance.
    ref = jnp.maximum(x @ w1 + b1, 0.0) @ w2 + b2
    assert jnp.allclose(out, ref, atol=2e-2, rtol=2e-2), (
        float(jnp.max(jnp.abs(out - ref))))

    print("KERNEL_OK")
</pallas_src>

<mosaic_0001>
module attributes {stable_mosaic.version = 11 : i64} {
  func.func @_fc_kernel(%arg0: i32, %arg1: memref<8x32xf32, #tpu.memory_space<vmem>>, %arg2: memref<32x64xbf16, #tpu.memory_space<vmem>>, %arg3: memref<1x64xf32, #tpu.memory_space<vmem>>, %arg4: memref<64x16xbf16, #tpu.memory_space<vmem>>, %arg5: memref<1x16xf32, #tpu.memory_space<vmem>>, %arg6: memref<8x16xf32, #tpu.memory_space<vmem>>) attributes {dimension_semantics = [#tpu.dimension_semantics<parallel>], iteration_bounds = array<i64: 2>, scalar_prefetch = 0 : i64, scratch_operands = 0 : i64, tpu.core_type = #tpu.core_type<tc>, window_params = [{transform_indices = @transform_0, window_bounds = array<i64: 8, 32>}, {pipeline_mode = #tpu.pipeline_mode<synchronous>, transform_indices = @transform_1, window_bounds = array<i64: 32, 64>}, {pipeline_mode = #tpu.pipeline_mode<synchronous>, transform_indices = @transform_2, window_bounds = array<i64: 1, 64>}, {pipeline_mode = #tpu.pipeline_mode<synchronous>, transform_indices = @transform_3, window_bounds = array<i64: 64, 16>}, {pipeline_mode = #tpu.pipeline_mode<synchronous>, transform_indices = @transform_4, window_bounds = array<i64: 1, 16>}, {transform_indices = @transform_5, window_bounds = array<i64: 8, 16>}]} {
    %c0 = arith.constant 0 : index
    %c0_0 = arith.constant 0 : index
    %0 = vector.load %arg1[%c0, %c0_0] : memref<8x32xf32, #tpu.memory_space<vmem>>, vector<8x32xf32>
    %1 = arith.truncf %0 : vector<8x32xf32> to vector<8x32xbf16>
    %c0_1 = arith.constant 0 : index
    %c0_2 = arith.constant 0 : index
    %2 = vector.load %arg2[%c0_1, %c0_2] : memref<32x64xbf16, #tpu.memory_space<vmem>>, vector<32x64xbf16>
    %cst = arith.constant dense<0.000000e+00> : vector<8x64xf32>
    %3 = tpu.matmul %1, %2, %cst {dimension_numbers = #tpu.dot_dimension_numbers<[1], [0], [0], [1], [0, 0, 1, 1], [], []>} : vector<8x32xbf16>, vector<32x64xbf16>, vector<8x64xf32> -> vector<8x64xf32>
    %c0_3 = arith.constant 0 : index
    %c0_4 = arith.constant 0 : index
    %4 = vector.load %arg3[%c0_3, %c0_4] : memref<1x64xf32, #tpu.memory_space<vmem>>, vector<1x64xf32>
    %5 = vector.broadcast %4 : vector<1x64xf32> to vector<8x64xf32>
    %6 = arith.addf %3, %5 : vector<8x64xf32>
    %cst_5 = arith.constant 0.000000e+00 : f32
    %7 = vector.broadcast %cst_5 : f32 to vector<8x64xf32>
    %8 = arith.maximumf %6, %7 : vector<8x64xf32>
    %9 = arith.truncf %8 : vector<8x64xf32> to vector<8x64xbf16>
    %c0_6 = arith.constant 0 : index
    %c0_7 = arith.constant 0 : index
    %10 = vector.load %arg4[%c0_6, %c0_7] : memref<64x16xbf16, #tpu.memory_space<vmem>>, vector<64x16xbf16>
    %cst_8 = arith.constant dense<0.000000e+00> : vector<8x16xf32>
    %11 = tpu.matmul %9, %10, %cst_8 {dimension_numbers = #tpu.dot_dimension_numbers<[1], [0], [0], [1], [0, 0, 1, 1], [], []>} : vector<8x64xbf16>, vector<64x16xbf16>, vector<8x16xf32> -> vector<8x16xf32>
    %c0_9 = arith.constant 0 : index
    %c0_10 = arith.constant 0 : index
    %12 = vector.load %arg5[%c0_9, %c0_10] : memref<1x16xf32, #tpu.memory_space<vmem>>, vector<1x16xf32>
    %13 = vector.broadcast %12 : vector<1x16xf32> to vector<8x16xf32>
    %14 = arith.addf %11, %13 : vector<8x16xf32>
    %c0_11 = arith.constant 0 : index
    %c0_12 = arith.constant 0 : index
    %15 = vector.load %arg6[%c0_11, %c0_12] : memref<8x16xf32, #tpu.memory_space<vmem>>, vector<8x16xf32>
    tpu.vector_store %arg6[%c0_11, %c0_12], %14 {strides = array<i32>} : memref<8x16xf32, #tpu.memory_space<vmem>>, vector<8x16xf32>,
    return
  }
  func.func @transform_0(%arg0: i32) -> (i32, i32) {
    %c0_i32 = arith.constant 0 : i32
    %c0_i32_0 = arith.constant 0 : i32
    return %arg0, %c0_i32 : i32, i32
  }
  func.func @transform_1(%arg0: i32) -> (i32, i32) {
    %c0_i32 = arith.constant 0 : i32
    %c0_i32_0 = arith.constant 0 : i32
    %c0_i32_1 = arith.constant 0 : i32
    return %c0_i32, %c0_i32_0 : i32, i32
  }
  func.func @transform_2(%arg0: i32) -> (i32, i32) {
    %c0_i32 = arith.constant 0 : i32
    %c0_i32_0 = arith.constant 0 : i32
    %c0_i32_1 = arith.constant 0 : i32
    return %c0_i32, %c0_i32_0 : i32, i32
  }
  func.func @transform_3(%arg0: i32) -> (i32, i32) {
    %c0_i32 = arith.constant 0 : i32
    %c0_i32_0 = arith.constant 0 : i32
    %c0_i32_1 = arith.constant 0 : i32
    return %c0_i32, %c0_i32_0 : i32, i32
  }
  func.func @transform_4(%arg0: i32) -> (i32, i32) {
    %c0_i32 = arith.constant 0 : i32
    %c0_i32_0 = arith.constant 0 : i32
    %c0_i32_1 = arith.constant 0 : i32
    return %c0_i32, %c0_i32_0 : i32, i32
  }
  func.func @transform_5(%arg0: i32) -> (i32, i32) {
    %c0_i32 = arith.constant 0 : i32
    %c0_i32_0 = arith.constant 0 : i32
    return %arg0, %c0_i32 : i32, i32
  }
}

</mosaic_0001>

<bundles_post_ra>
// kernel: tpu_custom_call.1
= control target key start
LH: loop header
LB: loop body
LE: loop exit
PB: predicated region body
PF: predicated region fallthrough
CT: control target
= control target key end

     0   :  { %10 = vsyncpa [#allocation3], 0  ;;  %s763_s0 = inlined_call_operand.vmem [shape: f32[16,32], index: 0, kind: input, shape index: {}]   ;;  %s764_s1 = inlined_call_operand.vmem [shape: bf16[32,64], index: 1, kind: input, shape index: {}]   ;;  %s765_s2 = inlined_call_operand.vmem [shape: f32[1,64], index: 2, kind: input, shape index: {}]   ;;  %s766_s3 = inlined_call_operand.vmem [shape: bf16[64,16], index: 3, kind: input, shape index: {}]   ;;  %s767_s4 = inlined_call_operand.vmem [shape: f32[1,16], index: 4, kind: input, shape index: {}]   ;;  %s768_s5 = inlined_call_operand.hbm [shape: f32[16,16], index: 5, kind: output, shape index: {}]  }
   0x1   :  { %12 = vsyncpa [#allocation3 + $0x1], 0  ;;  %s640_s18 = smov 0   ;;  %s642_s19 = smov 0  }
   0x2   :  { %s644_s20 = smov 0   ;;  %s646_s21 = smov 0  }
   0x3 LB: > { %s661_s22 = sadd.s32 4294967295, %s605_s21   ;;  %s450_s23 = sadd.s32 4294967294, %s605_s21   ;;  %s605_s21 = sphi %s646_s21, %s774_s21   ;;  %s601_s20 = sphi %s644_s20, %s773_s20   ;;  %s597_s19 = sphi %s642_s19, %s772_s19   ;;  %s593_s18 = sphi %s640_s18, %s771_s18  }
   0x4   : > { %s665_s24 = sadd.s32 1, %s605_s21   ;;  %s135_s25 = sadd.s32 1, %s601_s20 }
   0x5   : > { %s132_s26 = ssub.s32 %s605_s21, %s665_s24  ;;  %p145_p0 = scmp.ne.s32.totalorder %s601_s20, %s597_s19 }
   0x6   : > { %p133_p1 = scmp.eq.s32.totalorder %s132_s26, 0  ;;  %p146_p2 = scmp.eq.s32.totalorder %s661_s22, 1 }
   0x7   : > { %p151_p3 = scmp.ne.s32.totalorder %s597_s19, %s593_s18  ;;  %p152_p4 = scmp.eq.s32.totalorder %s450_s23, 1 }
   0x8   : > { %s676_s27 = scalar_select %p133_p1, %s601_s20, %s135_s25  }
   0x9   : > { %p678_p5 = por %p146_p2, %p145_p0  ;;  %p682_p6 = por %p152_p4, %p151_p3 }
   0xa   : > { %p453_p7 = scmp.ge.s32.totalorder %s605_s21, 1  ;;  %p189_p8 = scmp.lt.s32.totalorder %s605_s21, 3 }
   0xc   : > { %p190_p9 = pnand %p453_p7, %p189_p8 }
   0xd   : > { %p216_p10 = scmp.lt.s32.totalorder (!%p190_p9), %s661_s22, 1  ;;  %s213_s8 = sand.u32 (!%p190_p9), 1, %s597_s19  }
   0xe   : > { %193 = sbr.rel (%p190_p9) target bundleno = 436 (0x1b4), region = 40  ;;  %s454_s9 = sshll.u32 (!%p190_p9), %s213_s8, 3 }
   0xf   : > { %s467_s12 = sshll.u32 (!%p190_p9), %s661_s22, 7  ;;  %s215_s13 = scalar_lea.vmem (!%p190_p9), [#allocation2], %s454_s9 }
  0x10   : > { %s378_s23 = scalar_lea.sflag (!%p190_p9), [#allocation3], %s213_s8  ;;  %s609_s25 = smov (!%p190_p9), [#allocation2]  }
  0x11   : > { %s549_s26 = sshll.u32 (!%p190_p9), %s609_s25, 4  ;;  %s550_s26 = int_to_ptr.vmem [resolvable:$false] %s549_s26 }
  0x12   : > { %s551_s30 = scalar_lea.vmem (!%p190_p9), %s550_s26, 256 }
  0x13   : > { %v539_v0 = vld [vmem:[%s764_s1 + $0x8] sm:$0xff]   ;;  %v607_v1 = vmov 0.0   ;;  %v540_v2 = vld [vmem:[%s764_s1] sm:$0xff]   ;;  %vm608_vm0 = vmmov 0   ;;  %v541_v3 = vld [vmem:[%s766_s3 + $0x18] sm:$0xff]   ;;  %s217_s11 = scalar_select %p216_p10, %s661_s22, 1 }
  0x14   : > { %478 = vmatprep.subr.bf16.mxu0 %v607_v1  ;;  %486 = vmatprep.subr.bf16.mxu1 %v607_v1  ;;  %v542_v4 = vld [vmem:[%s766_s3 + $0x10] sm:$0xff]   ;;  %vm246_vm1 = vcmask 261120   ;;  %v543_v7 = vld [vmem:[%s766_s3 + $0x8] sm:$0xff]   ;;  %v544_v8 = vld [vmem:[%s766_s3] sm:$0xff]   ;;  %vm331_vm2 = vcmask 523264   ;;  %vm375_vm3 = vcmask 130048  }
  0x15   : > { %479 = vmatpush3.bf16.msra.mxu0 %v539_v0  ;;  %482 = vmatprep.mubr.msk.bf16.mxu0 %vm608_vm0, %v607_v1  ;;  %s455_s14 = sshll.u32 %s217_s11, 3  ;;  %v456_v9 = vld [vmem:[%s765_s2] ss:$0 sm:$0xff] }
  0x16   : > { %480 = vmatprep.subr.bf16.mxu0 %v607_v1  ;;  %494 = vmatprep.mubr.msk.bf16.mxu1 %vm608_vm0, %v607_v1  ;;  %s219_s17 = scalar_lea.vmem %s763_s0, %s455_s14  ;;  %v460_v17 = vld [vmem:[%s767_s4] ss:$0 sm:$0xff]  ;;  %s391_s14 = sshll.u32 %s215_s13, 4  ;;  %s724_s14 = int_to_ptr.vmem [resolvable:$true] %s391_s14 }
  0x17   : > { %487 = vmatpush3.bf16.msra.mxu1 %v541_v3  ;;  %v221_v5 = vld [vmem:[%s219_s17] sm:$0xff]  ;;  %s722_s17 = scalar_lea.hbm %s768_s5, %s467_s12  ;;  %s545_s22 = scalar_lea.vmem %s724_s14, 128 }
  0x18   : > { %488 = vmatprep.subr.bf16.mxu1 %v607_v1  ;;  %v222_v6 = vpack.c.bf16 %v221_v5, %v221_v5  ;;  %p546_p11 = scmp.ne.s32.totalorder %s724_s14, %s545_s22  ;;  %p552_p0 = scmp.lt.s32.totalorder %s724_s14, %s550_s26 }
  0x19   : > { %481 = vmatpush3.bf16.msra.mxu0 %v540_v2  ;;  %p553_p1 = scmp.lt.s32.totalorder %s551_s30, %s545_s22 }
  0x1a   : > { %p547_p12 = pnand %p546_p11, %p678_p5 }
  0x1b   : > { %489 = vmatpush3.bf16.msra.mxu1 %v542_v4  ;;  %p554_p2 = por %p553_p1, %p552_p0 }
  0x1c   : > { %490 = vmatprep.subr.bf16.mxu1 %v607_v1  ;;  %483 = vmatmul.mubr.msk.bf16.vlgmr.msra.gmra.mxu0 %vm246_vm1, %v222_v6  ;;  %p548_p13 = pneg %p547_p12 }
  0x1e   : > { %p555_p3 = pnand %p554_p2, %p548_p13 }
  0x1f   : > { %491 = vmatpush3.bf16.msra.mxu1 %v543_v7 }
  0x20   : > { %492 = vmatprep.subr.bf16.mxu1 %v607_v1 }
  0x23   : > { %493 = vmatpush3.bf16.msra.mxu1 %v544_v8 }
  0xdc   : > { %v284_v10 = vpop.f32.mrf.mxu0 }
  0xdd   : > { %v285_v11 = vadd.f32 %v456_v9, %v284_v10 }
  0xde   : > { %v484_v12 = vpop.f32.mrf.mxu0 }
  0xdf   : > { %v290_v13 = vmax.f32 %v285_v11, 0.0 }
  0xe0   : > { %v287_v14 = vpop.f32.mrf.mxu0 }
  0xe1   : > { %v291_v15 = vpack.c.bf16 %v290_v13, %v290_v13 }
  0xe2   : > { %v485_v16 = vpop.f32.mrf.mxu0 }
  0xe3   : > { %495 = vmatmul.mubr.msk.bf16.vlgmr.msra.gmra.mxu1 %vm331_vm2, %v291_v15 }
 0x1a3   : > { %v369_v18 = vpop.f32.mrf.mxu1 }
 0x1a4   : > { %v370_v19 = vadd.f32 %v460_v17, %v369_v18 }
 0x1a5   : > { %v496_v20 = vpop.f32.mrf.mxu1 }
 0x1a6   : > { %376 = vst.msk [vmem:[%s215_s13] sm:$0xff] %vm375_vm3, %v370_v19 }
 0x1a7   : > { %v372_v21 = vpop.f32.mrf.mxu1 }
 0x1a8   : > { %558 = shalt.err (!%p555_p3)
}
 0x1a9   : > { %s559_s6 = scalar_lea.hbm %s722_s17, 128  ;;  %s563_s9 = scalar_lea.hbm %s768_s5, 256 }
 0x1aa   : > { %p560_p4 = scmp.ne.s32.totalorder %s722_s17, %s559_s6  ;;  %p564_p9 = scmp.lt.s32.totalorder %s722_s17, %s768_s5 }
 0x1ab   : > { %p565_p10 = scmp.lt.s32.totalorder %s563_s9, %s559_s6 }
 0x1ac   : > { %p561_p7 = pnand %p560_p4, %p678_p5 }
 0x1ad   : > { %p566_p11 = por %p565_p10, %p564_p9 }
 0x1ae   : > { %p562_p8 = pneg %p561_p7 }
 0x1b0   : > { %p567_p12 = pnand %p566_p11, %p562_p8 }
 0x1b2   : > { %570 = shalt.err (!%p567_p12)
}
 0x1b3   : > { %498 = dma.vmem_to_hbm [thread:$0]  (%p678_p5), %s724_s14, 128, %s722_s17, %s378_s23   ;;  %v497_v22 = vpop.f32.mrf.mxu1 }
 0x1b4 PF: > { %p504_p13 = scmp.ge.s32.totalorder %s605_s21, 2  ;;  %s403_s12 = sand.u32 1, %s593_s18  }
 0x1b5   : > { %s404_s13 = scalar_lea.sflag [#allocation3], %s403_s12 }
 0x1b6   : > { %p501_p0 = pnand %p504_p13, %p682_p6 }
 0x1b8   : > { %p502_p1 = pneg %p501_p0 }
 0x1ba   : > { %588 = dma.done.wait (%p502_p1), %s404_s13, 128  }
 0x1bb   : > { %590 = vsyncadd (%p502_p1), %s404_s13, 4294967168  ;;  %p15_p2 = scmp.ge.s32.totalorder %s665_s24, 4   ;;  %s771_s18 = smov %s597_s19 }
 0x1bc   : > { %s772_s19 = smov %s601_s20  ;;  %s773_s20 = smov %s676_s27 }
 0x1bd   : > { %s774_s21 = smov %s665_s24  ;;  %17 = sbr.rel (!%p15_p2) target bundleno = 3 (0x3), region = 75 }
 0x1c2   :  { %409 = vsyncpa [#allocation3], 1 }
 0x1c3   :  { %411 = vsyncpa [#allocation3 + $0x1], 1 }

</bundles_post_ra>
